<compile_context>
chip_gen: v7x
topology: tpu7x:2x2x1
jax: 0.10.0
libtpu: 0.0.40
codegen_flags: <defaults>
</compile_context>

<pallas_src>
import functools

import jax
import jax.numpy as jnp
from jax.experimental import pallas as pl
from jax.experimental.pallas import tpu as pltpu

_LANE = 128
_SUBLANE = 8
_MIN_ROWS_FOR_SPLIT = 512            # force >=2 tiles above this (megacore on v7x)
_BUFFERED1_PARAM_BYTES = 4 << 20     # single-buffer resident params only when big


def _round_up(n, m):
    return ((n + m - 1) // m) * m


def _vmem_capacity_bytes():
    """Physical VMEM per TensorCore, with a conservative fallback."""
    try:
        info = pltpu.get_tpu_info()
        cap = getattr(info, "vmem_capacity_bytes", None)
        if cap:
            return int(cap)
    except Exception:
        pass
    return 64 << 20  # v7x-per-TC size; conservative for v5e/v6e


def prepare_params(params, *, mxu_dtype=None):
    """One-time (hoisted out of the forward path) parameter preparation.

    params: list of (W_t, b) with W_t of shape (in, out) -- i.e. nn.Linear
    weight transposed -- and b of shape (out,).

    Hidden-layer output widths are zero-padded to a multiple of 128 so all
    intermediate activations are lane-dense; the final layer keeps its true
    output width so the HBM writeback carries no junk lanes.  Zero-padded
    lanes propagate zeros through ReLU so the math is unchanged.  Weights are
    optionally cast to `mxu_dtype` (e.g. bf16) once, here; biases stay f32.
    """
    prepared = []
    prev_width = None
    n = len(params)
    w_dtype = jnp.float32 if mxu_dtype is None else mxu_dtype
    for i, (w_t, b) in enumerate(params):
        d_in, d_out = w_t.shape
        rows = d_in if prev_width is None else prev_width
        cols = d_out if i == n - 1 else _round_up(d_out, _LANE)
        w_p = jnp.zeros((rows, cols), w_dtype)
        w_p = w_p.at[:d_in, :d_out].set(jnp.asarray(w_t).astype(w_dtype))
        b_p = jnp.zeros((1, cols), jnp.float32)
        b_p = b_p.at[0, :d_out].set(jnp.asarray(b).astype(jnp.float32))
        prepared.append((w_p, b_p))
        prev_width = cols
    return prepared


def _mlp_policy_kernel(*refs, n_layers):
    """refs = (x_ref, w0, b0, ..., wN, bN, out_ref) for the current batch tile.

    ReLU after every layer except the last, which gets tanh -- exactly
    MLPDeterministicPolicy.forward.  f32 accumulation throughout; if the
    resident weights were prepared in bf16 the activations are cast to bf16
    only as MXU operands (ReLU / tanh / bias add stay f32).
    """
    x_ref, out_ref = refs[0], refs[-1]
    param_refs = refs[1:-1]
    h = x_ref[...].astype(jnp.float32)
    for i in range(n_layers):
        w = param_refs[2 * i][...]           # (in_width, out_width)
        b = param_refs[2 * i + 1][...]       # (1, out_width), f32
        lhs = h if w.dtype == jnp.float32 else h.astype(w.dtype)
        h = jnp.dot(lhs, w, preferred_element_type=jnp.float32)
        h = h + b
        if i < n_layers - 1:
            h = jnp.maximum(h, 0.0)          # F.relu (VPU, f32)
        else:
            h = jnp.tanh(h)                  # torch.tanh (EUP, f32)
    out_ref[...] = h.astype(out_ref.dtype)


def mlp_deterministic_policy_forward(x, prepared_params, *, batch_tile=2048):
    """x: (B, input_dim) or (input_dim,); prepared_params from prepare_params."""
    x = jnp.asarray(x, jnp.float32)
    squeeze = x.ndim == 1
    if squeeze:
        x = x[None, :]
    batch, in_dim = x.shape
    out_dim = int(prepared_params[-1][0].shape[1])
    n_layers = len(prepared_params)

    # ---- batch tiling ------------------------------------------------------
    # * at least cdiv(batch, batch_tile) tiles so a tile fits in VMEM,
    # * at least 2 (and an even number of) tiles once the batch is big enough,
    #   so dimension_semantics=("parallel",) can shard across v7x's 2 TCs,
    # * tb rounded up only to the 8-row sublane so the last tile is never
    #   mostly padding.
    n_tiles = -(-batch // batch_tile)
    if n_tiles == 1 and batch >= _MIN_ROWS_FOR_SPLIT:
        n_tiles = 2
    if n_tiles > 1 and n_tiles % 2 == 1:
        n_tiles += 1
    per_tile = -(-batch // n_tiles)
    tb = _round_up(per_tile, _SUBLANE)
    b_pad = tb * n_tiles
    if b_pad != batch:
        x = jnp.pad(x, ((0, b_pad - batch), (0, 0)))

    flat_inputs = [x]
    for w_p, b_p in prepared_params:
        flat_inputs += [w_p, b_p]
    out_shape = jax.ShapeDtypeStruct((b_pad, out_dim), jnp.float32)
    kernel = functools.partial(_mlp_policy_kernel, n_layers=n_layers)

    # ---- VMEM budget: resident params + streamed x/out tiles + activations --
    param_bytes = sum(int(w.size) * w.dtype.itemsize + int(b.size) * b.dtype.itemsize
                      for w, b in prepared_params)
    widest = max([in_dim, out_dim] + [int(w.shape[1]) for w, _ in prepared_params])
    io_bytes = 2 * 4 * tb * (in_dim + out_dim)   # double-buffered x / out tiles
    act_bytes = 4 * 4 * tb * widest              # activation temporaries
    cap = _vmem_capacity_bytes() - (8 << 20)     # leave compiler headroom (v7x!)
    vmem_limit = int(max(32 << 20, min(cap, 2 * (param_bytes + io_bytes + act_bytes))))

    # ---- cost estimate: lets XLA overlap this short kernel with neighbours --
    flops = 2 * b_pad * sum(int(w.shape[0]) * int(w.shape[1])
                            for w, _ in prepared_params)
    cost = pl.CostEstimate(
        flops=int(flops),
        transcendentals=int(b_pad * out_dim),
        bytes_accessed=int(4 * b_pad * (in_dim + out_dim) + param_bytes),
    )

    if n_tiles == 1:
        # Whole problem resident in VMEM: no grid, no pipeline overhead.
        result = pl.pallas_call(
            kernel,
            out_shape=out_shape,
            in_specs=[pl.BlockSpec(memory_space=pltpu.MemorySpace.VMEM)
                      for _ in flat_inputs],
            out_specs=pl.BlockSpec(memory_space=pltpu.MemorySpace.VMEM),
            compiler_params=pltpu.CompilerParams(vmem_limit_bytes=vmem_limit),
            cost_estimate=cost,
        )(*flat_inputs)
    else:
        # Batch-tiled grid: x/out tiles stream (DMA of tile i+1 under compute
        # of tile i); weights/biases stay VMEM-resident via a constant
        # index_map (single-buffered only when their footprint is large).
        single_buffer = param_bytes >= _BUFFERED1_PARAM_BYTES
        in_specs = [pl.BlockSpec((tb, in_dim), lambda i: (i, 0))]
        for w_p, b_p in prepared_params:
            for arr in (w_p, b_p):
                if single_buffer:
                    in_specs.append(pl.BlockSpec(arr.shape, lambda i: (0, 0),
                                                 pipeline_mode=pl.Buffered(1)))
                else:
                    in_specs.append(pl.BlockSpec(arr.shape, lambda i: (0, 0)))
        out_spec = pl.BlockSpec((tb, out_dim), lambda i: (i, 0))
        result = pl.pallas_call(
            kernel,
            out_shape=out_shape,
            grid=(n_tiles,),
            in_specs=in_specs,
            out_specs=out_spec,
            compiler_params=pltpu.CompilerParams(
                dimension_semantics=("parallel",),   # megacore-shardable (v7x)
                vmem_limit_bytes=vmem_limit,
            ),
            cost_estimate=cost,
        )(*flat_inputs)

    if b_pad != batch:
        result = result[:batch]          # drop padded batch rows only
    if squeeze:
        result = result[0]
    return result


def init_params(key, input_dim, output_dim, hidden_dims=(32,)):
    """Mimics nn.Linear's U(-1/sqrt(fan_in), 1/sqrt(fan_in)) init.

    Returns a list of (W_transposed, b) with W_t of shape (in, out).
    """
    dims = [input_dim, *hidden_dims, output_dim]
    params = []
    for i in range(len(dims) - 1):
        fan_in, fan_out = dims[i], dims[i + 1]
        key, kw, kb = jax.random.split(key, 3)
        bound = 1.0 / jnp.sqrt(jnp.asarray(fan_in, jnp.float32))
        w_t = jax.random.uniform(
            kw, (fan_in, fan_out), jnp.float32, minval=-bound, maxval=bound)
        b = jax.random.uniform(
            kb, (fan_out,), jnp.float32, minval=-bound, maxval=bound)
        params.append((w_t, b))
    return params


def reference_forward(x, params):
    """Pure-JAX reference matching the PyTorch forward semantics."""
    h = jnp.asarray(x, jnp.float32)
    for i, (w_t, b) in enumerate(params):
        h = h @ w_t + b
        h = jnp.maximum(h, 0.0) if i < len(params) - 1 else jnp.tanh(h)
    return h


if __name__ == "__main__":
    # Small shapes consistent with the module: input_dim=16, hidden=(32,), out=8.
    input_dim, output_dim = 16, 8
    hidden_dims = (32,)

    key = jax.random.PRNGKey(0)
    key, kx = jax.random.split(key)
    params = init_params(key, input_dim, output_dim, hidden_dims)

    # One-time parameter preparation (hoisted out of the forward path).
    prepared = prepare_params(params)

    # Path 1: single batch tile -> grid-free, everything resident in VMEM.
    x_small = jax.random.normal(kx, (8, input_dim), jnp.float32)
    out_small = jax.block_until_ready(
        mlp_deterministic_policy_forward(x_small, prepared))
    ref_small = reference_forward(x_small, params)
    assert out_small.shape == (8, output_dim)
    assert jnp.allclose(out_small, ref_small, atol=1e-5, rtol=1e-5), \
        "mismatch vs JAX reference (grid-free path)"

    # Path 2: batch-tiled "parallel" grid with VMEM-resident weights
    # (non-multiple batch exercises batch padding + even tile count).
    key, kx2 = jax.random.split(key)
    x_big = jax.random.normal(kx2, (70, input_dim), jnp.float32)
    out_big = jax.block_until_ready(
        mlp_deterministic_policy_forward(x_big, prepared, batch_tile=16))
    ref_big = reference_forward(x_big, params)
    assert out_big.shape == (70, output_dim)
    assert jnp.allclose(out_big, ref_big, atol=1e-5, rtol=1e-5), \
        "mismatch vs JAX reference (batch-tiled path)"

    # Path 3: bf16 MXU operands (cast once at prepare time), f32 accumulation.
    # Looser tolerance is expected precision loss, not a bug.
    prepared_bf16 = prepare_params(params, mxu_dtype=jnp.bfloat16)
    out_bf16 = jax.block_until_ready(
        mlp_deterministic_policy_forward(x_big, prepared_bf16, batch_tile=16))
    assert out_bf16.shape == (70, output_dim)
    assert jnp.allclose(out_bf16, ref_big, atol=5e-2, rtol=5e-2), \
        "mismatch vs JAX reference (bf16 MXU path)"

    print("KERNEL_OK")
</pallas_src>

<mosaic_0001>
module attributes {stable_mosaic.version = 11 : i64} {
  func.func @_mlp_policy_kernel(%arg0: memref<8x16xf32, #tpu.memory_space<vmem>>, %arg1: memref<16x128xf32, #tpu.memory_space<vmem>>, %arg2: memref<1x128xf32, #tpu.memory_space<vmem>>, %arg3: memref<128x8xf32, #tpu.memory_space<vmem>>, %arg4: memref<1x8xf32, #tpu.memory_space<vmem>>, %arg5: memref<8x8xf32, #tpu.memory_space<vmem>>) attributes {dimension_semantics = [], scalar_prefetch = 0 : i64, scratch_operands = 0 : i64, tpu.core_type = #tpu.core_type<tc>} {
    %c0 = arith.constant 0 : index
    %c0_0 = arith.constant 0 : index
    %0 = vector.load %arg0[%c0, %c0_0] : memref<8x16xf32, #tpu.memory_space<vmem>>, vector<8x16xf32>
    %c0_1 = arith.constant 0 : index
    %c0_2 = arith.constant 0 : index
    %1 = vector.load %arg1[%c0_1, %c0_2] : memref<16x128xf32, #tpu.memory_space<vmem>>, vector<16x128xf32>
    %c0_3 = arith.constant 0 : index
    %c0_4 = arith.constant 0 : index
    %2 = vector.load %arg2[%c0_3, %c0_4] : memref<1x128xf32, #tpu.memory_space<vmem>>, vector<1x128xf32>
    %cst = arith.constant dense<0.000000e+00> : vector<8x128xf32>
    %3 = tpu.matmul %0, %1, %cst {dimension_numbers = #tpu.dot_dimension_numbers<[1], [0], [0], [1], [0, 0, 1, 1], [], []>} : vector<8x16xf32>, vector<16x128xf32>, vector<8x128xf32> -> vector<8x128xf32>
    %4 = vector.broadcast %2 : vector<1x128xf32> to vector<8x128xf32>
    %5 = arith.addf %3, %4 : vector<8x128xf32>
    %cst_5 = arith.constant 0.000000e+00 : f32
    %6 = vector.broadcast %cst_5 : f32 to vector<8x128xf32>
    %7 = arith.maximumf %5, %6 : vector<8x128xf32>
    %c0_6 = arith.constant 0 : index
    %c0_7 = arith.constant 0 : index
    %8 = vector.load %arg3[%c0_6, %c0_7] : memref<128x8xf32, #tpu.memory_space<vmem>>, vector<128x8xf32>
    %c0_8 = arith.constant 0 : index
    %c0_9 = arith.constant 0 : index
    %9 = vector.load %arg4[%c0_8, %c0_9] : memref<1x8xf32, #tpu.memory_space<vmem>>, vector<1x8xf32>
    %cst_10 = arith.constant dense<0.000000e+00> : vector<8x8xf32>
    %10 = tpu.matmul %7, %8, %cst_10 {dimension_numbers = #tpu.dot_dimension_numbers<[1], [0], [0], [1], [0, 0, 1, 1], [], []>} : vector<8x128xf32>, vector<128x8xf32>, vector<8x8xf32> -> vector<8x8xf32>
    %11 = vector.broadcast %9 : vector<1x8xf32> to vector<8x8xf32>
    %12 = arith.addf %10, %11 : vector<8x8xf32>
    %13 = math.tanh %12 : vector<8x8xf32>
    %c0_11 = arith.constant 0 : index
    %c0_12 = arith.constant 0 : index
    %14 = vector.load %arg5[%c0_11, %c0_12] : memref<8x8xf32, #tpu.memory_space<vmem>>, vector<8x8xf32>
    tpu.vector_store %arg5[%c0_11, %c0_12], %13 {strides = array<i32>} : memref<8x8xf32, #tpu.memory_space<vmem>>, vector<8x8xf32>,
    return
  }
}

</mosaic_0001>

<bundles_post_ra>
// kernel: tpu_custom_call.1
= control target key start
LH: loop header
LB: loop body
LE: loop exit
PB: predicated region body
PF: predicated region fallthrough
CT: control target
= control target key end

     0   :  { %v338_v2 = vmov 0.0|0.0   ;;  %vm339_vm0 = vmmov 0   ;;  %v340_v4 = vmov 0.0   ;;  %vm31_vm1 = vcmask 130048   ;;  %s447_s0 = inlined_call_operand.vmem [shape: f32[8,16], index: 0, kind: input, shape index: {}]   ;;  %s448_s1 = inlined_call_operand.vmem [shape: f32[16,128], index: 1, kind: input, shape index: {}]   ;;  %s449_s2 = inlined_call_operand.vmem [shape: f32[1,128], index: 2, kind: input, shape index: {}]   ;;  %s450_s3 = inlined_call_operand.vmem [shape: f32[128,8], index: 3, kind: input, shape index: {}]   ;;  %s451_s4 = inlined_call_operand.vmem [shape: f32[1,8], index: 4, kind: input, shape index: {}]   ;;  %s452_s5 = inlined_call_operand.hbm [shape: f32[8,8], index: 5, kind: output, shape index: {}]  }
   0x1   :  { %v22_v0 = vld [vmem:[%s448_s1] sm:$0xff]  ;;  %v23_v1 = vld [vmem:[%s448_s1 + $0x8] sm:$0xff]  ;;  %281 = vmatprep.subr.bf16.mxu0 %v338_v2  ;;  %243 = vmatprep.mubr.msk.f32.mxu0 %vm339_vm0, %v340_v4  ;;  %v108_v7 = vld [vmem:[%s450_s3 + $0x10] sm:$0xff] }
   0x2   :  { %v282_v3 = vpack.c.bf16 %v23_v1, %v22_v0  ;;  %v106_v5 = vld [vmem:[%s450_s3] sm:$0xff]  ;;  %v107_v6 = vld [vmem:[%s450_s3 + $0x8] sm:$0xff]  ;;  %284 = vmatprep.subr.bf16.mxu1 %v338_v2  ;;  %v109_v9 = vld [vmem:[%s450_s3 + $0x18] sm:$0xff]  ;;  %278 = vmatprep.mubr.msk.f32.mxu1 %vm339_vm0, %v340_v4 }
   0x3   :  { %v285_v8 = vpack.c.bf16 %v107_v6, %v106_v5  ;;  %v21_v10 = vld [vmem:[%s447_s0] sm:$0xff]  ;;  %v288_v11 = vpack.c.bf16 %v109_v9, %v108_v7  ;;  %v111_v13 = vld [vmem:[%s450_s3 + $0x28] sm:$0xff] }
   0x4   :  { %283 = vmatpush3.bf16.msra.mxu0 %v282_v3  ;;  %v110_v12 = vld [vmem:[%s450_s3 + $0x20] sm:$0xff] }
   0x5   :  { %286 = vmatpush3.bf16.msra.mxu1 %v285_v8 }
   0x6   :  { %287 = vmatprep.subr.bf16.mxu1 %v338_v2 }
   0x7   :  { %244 = vmatmul.mubr.msk.f32.vlgmr.msra.gmra.mrb[0].mxu0 %vm31_vm1, %v21_v10 }
   0x8   :  { %10 = vsyncpa [#allocation3], 0  ;;  %v291_v14 = vpack.c.bf16 %v111_v13, %v110_v12  ;;  %v112_v15 = vld [vmem:[%s450_s3 + $0x30] sm:$0xff]  ;;  %v113_v16 = vld [vmem:[%s450_s3 + $0x38] sm:$0xff]  ;;  %vm200_vm2 = vcmask 64512  }
   0x9   :  { %289 = vmatpush3.bf16.msra.mxu1 %v288_v11  ;;  %v294_v17 = vpack.c.bf16 %v113_v16, %v112_v15  ;;  %v114_v18 = vld [vmem:[%s450_s3 + $0x40] sm:$0xff]  ;;  %v115_v19 = vld [vmem:[%s450_s3 + $0x48] sm:$0xff]  ;;  %v116_v21 = vld [vmem:[%s450_s3 + $0x50] sm:$0xff] }
   0xa   :  { %290 = vmatprep.subr.bf16.mxu1 %v338_v2  ;;  %v297_v20 = vpack.c.bf16 %v115_v19, %v114_v18  ;;  %v117_v22 = vld [vmem:[%s450_s3 + $0x58] sm:$0xff]  ;;  %v118_v24 = vld [vmem:[%s450_s3 + $0x60] sm:$0xff]  ;;  %v119_v25 = vld [vmem:[%s450_s3 + $0x68] sm:$0xff] }
   0xb   :  { %v300_v23 = vpack.c.bf16 %v117_v22, %v116_v21  ;;  %v303_v26 = vpack.c.bf16 %v119_v25, %v118_v24  ;;  %v120_v27 = vld [vmem:[%s450_s3 + $0x70] sm:$0xff]  ;;  %v121_v28 = vld [vmem:[%s450_s3 + $0x78] sm:$0xff]  ;;  %v216_v30 = vld [vmem:[%s449_s2] ss:$0 sm:$0xff]  ;;  %s341_s3 = smov [#allocation2]  }
   0xc   :  { %v306_v29 = vpack.c.bf16 %v121_v28, %v120_v27  ;;  %v218_v35 = vld [vmem:[%s451_s4] ss:$0 sm:$0xff]  ;;  %s208_s7 = sshll.u32 %s341_s3, 4  ;;  %s209_s7 = int_to_ptr.vmem [resolvable:$true] %s208_s7 }
   0xd   :  { %292 = vmatpush3.bf16.msra.mxu1 %v291_v14  ;;  %s314_s2 = scalar_lea.vmem %s209_s7, 128  ;;  %p319_p1 = scmp.lt.s32.totalorder %s209_s7, %s209_s7 }
   0xe   :  { %293 = vmatprep.subr.bf16.mxu1 %v338_v2  ;;  %p315_p0 = scmp.ne.s32.totalorder %s209_s7, %s314_s2  ;;  %p320_p2 = scmp.lt.s32.totalorder %s314_s2, %s314_s2 }
  0x10   :  { %p321_p3 = por %p320_p2, %p319_p1 }
  0x11   :  { %295 = vmatpush3.bf16.msra.mxu1 %v294_v17 }
  0x12   :  { %296 = vmatprep.subr.bf16.mxu1 %v338_v2  ;;  %p322_p4 = pnand %p321_p3, %p315_p0 }
  0x15   :  { %298 = vmatpush3.bf16.msra.mxu1 %v297_v20 }
  0x16   :  { %299 = vmatprep.subr.bf16.mxu1 %v338_v2 }
  0x19   :  { %301 = vmatpush3.bf16.msra.mxu1 %v300_v23 }
  0x1a   :  { %302 = vmatprep.subr.bf16.mxu1 %v338_v2 }
  0x1d   :  { %304 = vmatpush3.bf16.msra.mxu1 %v303_v26 }
  0x1e   :  { %305 = vmatprep.subr.bf16.mxu1 %v338_v2 }
  0x21   :  { %307 = vmatpush3.bf16.msra.mxu1 %v306_v29 }
  0xda   :  { %v101_v31 = vpop.f32.mrb[0].mxu0 }
  0xdb   :  { %v102_v32 = vadd.f32 %v216_v30, %v101_v31  ;;  %v245_v33 = vpop.f32.mrb[1].mxu0 }
  0xdd   :  { %v105_v34 = vmax.f32 %v102_v32, 0.0 }
  0xdf   :  { %279 = vmatmul.mubr.f32.vlgmr.msra.gmra.mrb[0].mxu1 %v105_v34 }
 0x1b2   :  { %v195_v36 = vpop.f32.mrb[0].mxu1 }
 0x1b3   :  { %v196_v37 = vadd.f32 %v218_v35, %v195_v36  ;;  %v280_v38 = vpop.f32.mrb[1].mxu1 }
 0x1b5   :  { %312 = vtanh.f32 %v196_v37 }
 0x1bf   :  { %v313_v39 = vpop.eup %312 }
 0x1c0   :  { %201 = vst.msk [vmem:[#allocation2] sm:$0xff] %vm200_vm2, %v313_v39 }
 0x1c1   :  { %325 = shalt.err (!%p322_p4)
}
 0x1c2   :  { %s326_s4 = scalar_lea.hbm %s452_s5, 128 }
 0x1c3   :  { %p327_p5 = scmp.ne.s32.totalorder %s452_s5, %s326_s4  ;;  %p330_p6 = scmp.lt.u32.totalorder %s326_s4, %s452_s5 }
 0x1c5   :  { %p332_p7 = pnand %p330_p6, %p327_p5 }
 0x1c7   :  { %335 = shalt.err (!%p332_p7)
}
 0x1c8   :  { %211 = dma.vmem_to_hbm [thread:$0]  %s209_s7, 128, %s452_s5, [#allocation3]  }
 0x1c9   :  { %336 = dma.done.wait [#allocation3], 128  }
 0x1ca   :  { %337 = vsyncadd [#allocation3], 4294967168 }
 0x1cb   :  { %215 = vsyncpa [#allocation3], 1 }

</bundles_post_ra>
